<compile_context>
chip_gen: v7x
topology: tpu7x:2x2x1
jax: 0.10.0
libtpu: 0.0.40
codegen_flags: <defaults>
</compile_context>

<pallas_src>
import functools

import jax
import jax.numpy as jnp
from jax.experimental import pallas as pl
from jax.experimental.pallas import tpu as pltpu


def _round_up(x, m):
    return ((x + m - 1) // m) * m


# Below this batch size, megacore sharding would duplicate the ~590 KB weight DMA per
# core for essentially zero compute win, so we keep a single grid step / single core.
_MEGACORE_MIN_B = 768


def policy_net_kernel(x_ref, w1_ref, b1_ref, w2_ref, b2_ref, w3_ref, b3_ref, o_ref):
    """One batch tile of the full MLP, everything VMEM resident.

    x_ref : [TB, D_in]  bf16
    w1    : [D_in, H]   bf16    b1: [1, H]   f32
    w2    : [H, H]      bf16    b2: [1, H]   f32
    w3    : [H, P=128]  bf16    b3: [1, P]   f32 (padded lanes = -1e30)
    o_ref : [TB, P]     bf16 softmax probabilities (only the first 3 lanes are real)
    """
    x = x_ref[...]

    # Layer 1: Linear + ReLU  (bf16 MXU matmul, f32 accumulation)
    h1 = jnp.dot(x, w1_ref[...], preferred_element_type=jnp.float32) + b1_ref[...]
    h1 = jnp.maximum(h1, 0.0).astype(jnp.bfloat16)

    # Layer 2: Linear + ReLU
    h2 = jnp.dot(h1, w2_ref[...], preferred_element_type=jnp.float32) + b2_ref[...]
    h2 = jnp.maximum(h2, 0.0).astype(jnp.bfloat16)

    # Layer 3: Linear -> logits (lane-dense 128 wide; padded lanes carry -1e30 bias)
    logits = jnp.dot(h2, w3_ref[...], preferred_element_type=jnp.float32) + b3_ref[...]

    # Numerically stable softmax in f32 over the 128-wide block; padded lanes -> exp==0.
    m = jnp.max(logits, axis=-1, keepdims=True)
    e = jnp.exp(logits - m)
    o_ref[...] = (e / jnp.sum(e, axis=-1, keepdims=True)).astype(o_ref.dtype)


@functools.partial(jax.jit, static_argnames=("max_block_b",))
def policy_network_forward(state, params, *, max_block_b=1024):
    """MLP forward.  Returns the lane-padded [Bp, 128] bf16 probability block.

    Consumers should slice `out[:B, :3]` at their own use site (where it fuses) --
    the padded block is returned directly so this call does not spend an extra HBM
    pass just to drop the padding.
    """
    w1, b1, w2, b2, w3, b3 = params
    B, D_in = state.shape
    H = w1.shape[1]
    P = w3.shape[1]  # lane-padded output width (128)

    if state.dtype != jnp.bfloat16:
        # Fallback only -- producers should emit bf16 so this cast never materializes.
        state = state.astype(jnp.bfloat16)

    # --- Tile / grid selection ------------------------------------------------------
    # Small batch: one tile == whole (padded) batch -> single grid step.
    # Large batch: >= 2 tiles of at most max_block_b rows, marked "parallel" (megacore).
    if B < _MEGACORE_MIN_B:
        n_steps = 1
    else:
        n_steps = max(2, pl.cdiv(B, max_block_b))
    tb = _round_up(pl.cdiv(B, n_steps), 16)  # multiple of 16 (bf16 sublane packing)
    Bp = n_steps * tb
    if Bp != B:
        state = jnp.pad(state, ((0, Bp - B), (0, 0)))

    weight_bytes = (w1.size + w2.size + w3.size) * 2 + (b1.size + b2.size + b3.size) * 4

    # Scoped-VMEM estimate: double-buffered x/out blocks + (double-buffered) resident
    # weights + f32 intermediates.  Only override the compiler default (16 MiB scoped
    # on v5e) when we would actually exceed it.
    vmem_est = (2 * tb * D_in * 2) + (2 * tb * P * 2) + 2 * weight_bytes \
        + tb * (2 * H + P) * 4
    vmem_limit = None
    if vmem_est > (14 << 20):
        vmem_limit = min(int(vmem_est * 3 // 2) + (4 << 20), 64 << 20)

    # Advisory only.  Note: with megacore "parallel" sharding (n_steps > 1 on v7x) the
    # weights are fetched once per core, so this undercounts weight bytes by ~2x there.
    cost = pl.CostEstimate(
        flops=2 * Bp * (D_in * H + H * H + H * P),
        bytes_accessed=weight_bytes + Bp * D_in * 2 + Bp * P * 2,
        transcendentals=Bp * P,
    )

    out = pl.pallas_call(
        policy_net_kernel,
        out_shape=jax.ShapeDtypeStruct((Bp, P), jnp.bfloat16),
        grid_spec=pltpu.PrefetchScalarGridSpec(
            num_scalar_prefetch=0,
            grid=(n_steps,),
            in_specs=[
                pl.BlockSpec((tb, D_in), lambda i: (i, 0)),   # state: streamed per tile
                pl.BlockSpec((D_in, H), lambda i: (0, 0)),    # w1: VMEM-resident
                pl.BlockSpec((1, H),    lambda i: (0, 0)),    # b1
                pl.BlockSpec((H, H),    lambda i: (0, 0)),    # w2
                pl.BlockSpec((1, H),    lambda i: (0, 0)),    # b2
                pl.BlockSpec((H, P),    lambda i: (0, 0)),    # w3 (lane-padded to 128)
                pl.BlockSpec((1, P),    lambda i: (0, 0)),    # b3 (padded lanes = -1e30)
            ],
            out_specs=pl.BlockSpec((tb, P), lambda i: (i, 0)),
        ),
        compiler_params=pltpu.CompilerParams(
            dimension_semantics=("parallel",) if n_steps > 1 else ("arbitrary",),
            vmem_limit_bytes=vmem_limit,
        ),
        cost_estimate=cost,
    )(state, w1, b1, w2, b2, w3, b3)

    return out


def init_params(key, input_dim=768, hidden_dim=256, output_dim=3, pad_out=128):
    """Synthetic init mimicking PyTorch Linear's U(-1/sqrt(fan_in), 1/sqrt(fan_in)).

    Weights stored as [in, out] (transpose of torch Linear.weight) in bf16;
    biases as [1, out] rows in f32.  Layer 3 is lane-padded to `pad_out`.
    """
    ks = jax.random.split(key, 6)

    def lin(kw, kb, fan_in, fan_out):
        bound = 1.0 / jnp.sqrt(jnp.float32(fan_in))
        w = jax.random.uniform(kw, (fan_in, fan_out), jnp.float32, -bound, bound)
        b = jax.random.uniform(kb, (1, fan_out), jnp.float32, -bound, bound)
        return w, b

    w1, b1 = lin(ks[0], ks[1], input_dim, hidden_dim)
    w2, b2 = lin(ks[2], ks[3], hidden_dim, hidden_dim)
    w3, b3 = lin(ks[4], ks[5], hidden_dim, output_dim)

    # Lane-pad layer 3: zero weight columns, -1e30 bias so padded logits never win.
    w3p = jnp.zeros((hidden_dim, pad_out), jnp.float32).at[:, :output_dim].set(w3)
    b3p = jnp.full((1, pad_out), -1e30, jnp.float32).at[:, :output_dim].set(b3)

    return (
        w1.astype(jnp.bfloat16), b1,
        w2.astype(jnp.bfloat16), b2,
        w3p.astype(jnp.bfloat16), b3p,
    )


def reference_forward(state, params, output_dim=3):
    """Pure-JAX reference using the same bf16 parameters and cast points."""
    w1, b1, w2, b2, w3, b3 = params
    x = state.astype(jnp.bfloat16)
    h1 = jnp.maximum(jnp.dot(x, w1, preferred_element_type=jnp.float32) + b1, 0.0)
    h2 = jnp.maximum(
        jnp.dot(h1.astype(jnp.bfloat16), w2, preferred_element_type=jnp.float32) + b2, 0.0)
    logits = jnp.dot(h2.astype(jnp.bfloat16), w3, preferred_element_type=jnp.float32) + b3
    return jax.nn.softmax(logits, axis=-1)[:, :output_dim]


if __name__ == "__main__":
    key = jax.random.PRNGKey(0)
    k_params, k_state = jax.random.split(key)

    input_dim, hidden_dim, output_dim = 768, 256, 3
    batch = 16  # small batch -> single grid step, single core, no weight duplication

    params = init_params(k_params, input_dim, hidden_dim, output_dim)
    # Producer emits bf16 directly: no standalone f32->bf16 HBM pass before the kernel.
    state = jax.random.normal(k_state, (batch, input_dim), dtype=jnp.bfloat16)

    padded = policy_network_forward(state, params)
    padded = jax.block_until_ready(padded)

    # Consumer-side slice (in a real pipeline this fuses into whatever reads the probs).
    out = padded[:batch, :output_dim].astype(jnp.float32)
    ref = reference_forward(state, params, output_dim=output_dim)

    assert padded.dtype == jnp.bfloat16 and padded.shape[0] >= batch, padded.shape
    assert out.shape == (batch, output_dim), out.shape
    # Padded lanes must carry ~0 probability; real lanes sum to ~1 (bf16 output).
    row_sum_all = jnp.sum(padded.astype(jnp.float32), axis=-1)[:batch]
    assert jnp.allclose(row_sum_all, 1.0, atol=1e-2), "padded lanes leaked probability"
    assert jnp.allclose(jnp.sum(out, axis=-1), 1.0, atol=1e-2), "probs do not sum to 1"
    max_err = float(jnp.max(jnp.abs(out - ref)))
    assert jnp.allclose(out, ref, atol=7.5e-3, rtol=7.5e-3), max_err

    print("KERNEL_OK")
</pallas_src>

<mosaic_0001>
module attributes {stable_mosaic.version = 11 : i64} {
  func.func @policy_net_kernel(%arg0: i32, %arg1: memref<16x768xbf16, #tpu.memory_space<vmem>>, %arg2: memref<768x256xbf16, #tpu.memory_space<vmem>>, %arg3: memref<1x256xf32, #tpu.memory_space<vmem>>, %arg4: memref<256x256xbf16, #tpu.memory_space<vmem>>, %arg5: memref<1x256xf32, #tpu.memory_space<vmem>>, %arg6: memref<256x128xbf16, #tpu.memory_space<vmem>>, %arg7: memref<1x128xf32, #tpu.memory_space<vmem>>, %arg8: memref<16x128xbf16, #tpu.memory_space<vmem>>) attributes {dimension_semantics = [#tpu.dimension_semantics<arbitrary>], iteration_bounds = array<i64: 1>, scalar_prefetch = 0 : i64, scratch_operands = 0 : i64, tpu.core_type = #tpu.core_type<tc>, window_params = [{transform_indices = @transform_0, window_bounds = array<i64: 16, 768>}, {pipeline_mode = #tpu.pipeline_mode<synchronous>, transform_indices = @transform_1, window_bounds = array<i64: 768, 256>}, {pipeline_mode = #tpu.pipeline_mode<synchronous>, transform_indices = @transform_2, window_bounds = array<i64: 1, 256>}, {pipeline_mode = #tpu.pipeline_mode<synchronous>, transform_indices = @transform_3, window_bounds = array<i64: 256, 256>}, {pipeline_mode = #tpu.pipeline_mode<synchronous>, transform_indices = @transform_4, window_bounds = array<i64: 1, 256>}, {pipeline_mode = #tpu.pipeline_mode<synchronous>, transform_indices = @transform_5, window_bounds = array<i64: 256, 128>}, {pipeline_mode = #tpu.pipeline_mode<synchronous>, transform_indices = @transform_6, window_bounds = array<i64: 1, 128>}, {transform_indices = @transform_7, window_bounds = array<i64: 16, 128>}]} {
    %c0 = arith.constant 0 : index
    %c0_0 = arith.constant 0 : index
    %0 = vector.load %arg1[%c0, %c0_0] : memref<16x768xbf16, #tpu.memory_space<vmem>>, vector<16x768xbf16>
    %c0_1 = arith.constant 0 : index
    %c0_2 = arith.constant 0 : index
    %1 = vector.load %arg2[%c0_1, %c0_2] : memref<768x256xbf16, #tpu.memory_space<vmem>>, vector<768x256xbf16>
    %cst = arith.constant dense<0.000000e+00> : vector<16x256xf32>
    %2 = tpu.matmul %0, %1, %cst {dimension_numbers = #tpu.dot_dimension_numbers<[1], [0], [0], [1], [0, 0, 1, 1], [], []>} : vector<16x768xbf16>, vector<768x256xbf16>, vector<16x256xf32> -> vector<16x256xf32>
    %c0_3 = arith.constant 0 : index
    %c0_4 = arith.constant 0 : index
    %3 = vector.load %arg3[%c0_3, %c0_4] : memref<1x256xf32, #tpu.memory_space<vmem>>, vector<1x256xf32>
    %4 = vector.broadcast %3 : vector<1x256xf32> to vector<16x256xf32>
    %5 = arith.addf %2, %4 : vector<16x256xf32>
    %cst_5 = arith.constant 0.000000e+00 : f32
    %6 = vector.broadcast %cst_5 : f32 to vector<16x256xf32>
    %7 = arith.maximumf %5, %6 : vector<16x256xf32>
    %8 = arith.truncf %7 : vector<16x256xf32> to vector<16x256xbf16>
    %c0_6 = arith.constant 0 : index
    %c0_7 = arith.constant 0 : index
    %9 = vector.load %arg4[%c0_6, %c0_7] : memref<256x256xbf16, #tpu.memory_space<vmem>>, vector<256x256xbf16>
    %cst_8 = arith.constant dense<0.000000e+00> : vector<16x256xf32>
    %10 = tpu.matmul %8, %9, %cst_8 {dimension_numbers = #tpu.dot_dimension_numbers<[1], [0], [0], [1], [0, 0, 1, 1], [], []>} : vector<16x256xbf16>, vector<256x256xbf16>, vector<16x256xf32> -> vector<16x256xf32>
    %c0_9 = arith.constant 0 : index
    %c0_10 = arith.constant 0 : index
    %11 = vector.load %arg5[%c0_9, %c0_10] : memref<1x256xf32, #tpu.memory_space<vmem>>, vector<1x256xf32>
    %12 = vector.broadcast %11 : vector<1x256xf32> to vector<16x256xf32>
    %13 = arith.addf %10, %12 : vector<16x256xf32>
    %cst_11 = arith.constant 0.000000e+00 : f32
    %14 = vector.broadcast %cst_11 : f32 to vector<16x256xf32>
    %15 = arith.maximumf %13, %14 : vector<16x256xf32>
    %16 = arith.truncf %15 : vector<16x256xf32> to vector<16x256xbf16>
    %c0_12 = arith.constant 0 : index
    %c0_13 = arith.constant 0 : index
    %17 = vector.load %arg6[%c0_12, %c0_13] : memref<256x128xbf16, #tpu.memory_space<vmem>>, vector<256x128xbf16>
    %cst_14 = arith.constant dense<0.000000e+00> : vector<16x128xf32>
    %18 = tpu.matmul %16, %17, %cst_14 {dimension_numbers = #tpu.dot_dimension_numbers<[1], [0], [0], [1], [0, 0, 1, 1], [], []>} : vector<16x256xbf16>, vector<256x128xbf16>, vector<16x128xf32> -> vector<16x128xf32>
    %c0_15 = arith.constant 0 : index
    %c0_16 = arith.constant 0 : index
    %19 = vector.load %arg7[%c0_15, %c0_16] : memref<1x128xf32, #tpu.memory_space<vmem>>, vector<1x128xf32>
    %20 = vector.broadcast %19 : vector<1x128xf32> to vector<16x128xf32>
    %21 = arith.addf %18, %20 : vector<16x128xf32>
    %cst_17 = arith.constant dense<0xFF800000> : vector<16xf32>
    %22 = vector.multi_reduction <maximumf>, %21, %cst_17 [1] : vector<16x128xf32> to vector<16xf32>
    %23 = vector.shape_cast %22 : vector<16xf32> to vector<16x1xf32>
    %24 = vector.broadcast %23 : vector<16x1xf32> to vector<16x128xf32>
    %25 = arith.subf %21, %24 : vector<16x128xf32>
    %26 = math.exp %25 : vector<16x128xf32>
    %cst_18 = arith.constant dense<0.000000e+00> : vector<16xf32>
    %27 = vector.multi_reduction <add>, %26, %cst_18 [1] : vector<16x128xf32> to vector<16xf32>
    %28 = vector.shape_cast %27 : vector<16xf32> to vector<16x1xf32>
    %29 = vector.broadcast %28 : vector<16x1xf32> to vector<16x128xf32>
    %30 = arith.divf %26, %29 : vector<16x128xf32>
    %31 = arith.truncf %30 : vector<16x128xf32> to vector<16x128xbf16>
    %c0_19 = arith.constant 0 : index
    %c0_20 = arith.constant 0 : index
    %32 = vector.load %arg8[%c0_19, %c0_20] : memref<16x128xbf16, #tpu.memory_space<vmem>>, vector<16x128xbf16>
    tpu.vector_store %arg8[%c0_19, %c0_20], %31 {strides = array<i32>} : memref<16x128xbf16, #tpu.memory_space<vmem>>, vector<16x128xbf16>,
    return
  }
  func.func @transform_0(%arg0: i32) -> (i32, i32) {
    %c0_i32 = arith.constant 0 : i32
    %c0_i32_0 = arith.constant 0 : i32
    return %arg0, %c0_i32 : i32, i32
  }
  func.func @transform_1(%arg0: i32) -> (i32, i32) {
    %c0_i32 = arith.constant 0 : i32
    %c0_i32_0 = arith.constant 0 : i32
    %c0_i32_1 = arith.constant 0 : i32
    return %c0_i32, %c0_i32_0 : i32, i32
  }
  func.func @transform_2(%arg0: i32) -> (i32, i32) {
    %c0_i32 = arith.constant 0 : i32
    %c0_i32_0 = arith.constant 0 : i32
    %c0_i32_1 = arith.constant 0 : i32
    return %c0_i32, %c0_i32_0 : i32, i32
  }
  func.func @transform_3(%arg0: i32) -> (i32, i32) {
    %c0_i32 = arith.constant 0 : i32
    %c0_i32_0 = arith.constant 0 : i32
    %c0_i32_1 = arith.constant 0 : i32
    return %c0_i32, %c0_i32_0 : i32, i32
  }
  func.func @transform_4(%arg0: i32) -> (i32, i32) {
    %c0_i32 = arith.constant 0 : i32
    %c0_i32_0 = arith.constant 0 : i32
    %c0_i32_1 = arith.constant 0 : i32
    return %c0_i32, %c0_i32_0 : i32, i32
  }
  func.func @transform_5(%arg0: i32) -> (i32, i32) {
    %c0_i32 = arith.constant 0 : i32
    %c0_i32_0 = arith.constant 0 : i32
    %c0_i32_1 = arith.constant 0 : i32
    return %c0_i32, %c0_i32_0 : i32, i32
  }
  func.func @transform_6(%arg0: i32) -> (i32, i32) {
    %c0_i32 = arith.constant 0 : i32
    %c0_i32_0 = arith.constant 0 : i32
    %c0_i32_1 = arith.constant 0 : i32
    return %c0_i32, %c0_i32_0 : i32, i32
  }
  func.func @transform_7(%arg0: i32) -> (i32, i32) {
    %c0_i32 = arith.constant 0 : i32
    %c0_i32_0 = arith.constant 0 : i32
    return %arg0, %c0_i32 : i32, i32
  }
}

</mosaic_0001>

<bundles_post_ra>
// kernel: policy_network_forward.1
= control target key start
LH: loop header
LB: loop body
LE: loop exit
PB: predicated region body
PF: predicated region fallthrough
CT: control target
= control target key end

     0   :  { %12 = vsyncpa [#allocation3], 0  ;;  %s2005_s0 = inlined_call_operand.hbm [shape: bf16[16,768], index: 0, kind: input, shape index: {}]   ;;  %s2006_s1 = inlined_call_operand.hbm [shape: bf16[768,256], index: 1, kind: input, shape index: {}]   ;;  %s2007_s2 = inlined_call_operand.vmem [shape: f32[1,256], index: 2, kind: input, shape index: {}]   ;;  %s2008_s3 = inlined_call_operand.hbm [shape: bf16[256,256], index: 3, kind: input, shape index: {}]   ;;  %s2009_s4 = inlined_call_operand.vmem [shape: f32[1,256], index: 4, kind: input, shape index: {}]   ;;  %s2010_s5 = inlined_call_operand.hbm [shape: bf16[256,128], index: 5, kind: input, shape index: {}]   ;;  %s2011_s6 = inlined_call_operand.vmem [shape: f32[1,128], index: 6, kind: input, shape index: {}]   ;;  %s2012_s7 = inlined_call_operand.hbm [shape: bf16[16,128], index: 7, kind: output, shape index: {}]  }
   0x1   :  { %13 = vsyncpa [#allocation6], 0 }
   0x2   :  { %14 = vsyncpa [#allocation9], 0 }
   0x3   :  { %15 = vsyncpa [#allocation4], 0  ;;  %s1866_s24 = smov [#allocation5]   ;;  %s1748_s28 = scalar_lea.hbm %s2006_s1, 12288 }
   0x4   :  { %s33_s25 = sshll.u32 %s1866_s24, 4  ;;  %p1749_p0 = scmp.ne.s32.totalorder %s2006_s1, %s1748_s28  ;;  %s34_s25 = int_to_ptr.vmem [resolvable:$true] %s33_s25 }
   0x5   :  { %p1752_p1 = scmp.lt.u32.totalorder %s1748_s28, %s2006_s1 }
   0x7   :  { %p1754_p2 = pnand %p1752_p1, %p1749_p0 }
   0x9   :  { %1757 = shalt.err (!%p1754_p2)
}
   0xa   :  { %s1758_s10 = scalar_lea.vmem %s34_s25, 12288  ;;  %p1763_p4 = scmp.lt.s32.totalorder %s34_s25, %s34_s25 }
   0xb   :  { %p1759_p3 = scmp.ne.s32.totalorder %s34_s25, %s1758_s10  ;;  %p1764_p5 = scmp.lt.s32.totalorder %s1758_s10, %s1758_s10 }
   0xd   :  { %p1765_p6 = por %p1764_p5, %p1763_p4 }
   0xf   :  { %p1766_p7 = pnand %p1765_p6, %p1759_p3 }
  0x11   :  { %1769 = shalt.err (!%p1766_p7)
}
  0x12   :  { %s1867_s11 = smov 128   ;;  %s1868_s12 = smov 8  }
  0x13   :  { %39 = dma.hbm_to_vmem [thread:$0]  %s2006_s1, 12288, %s34_s25, [#allocation6], %s1867_s11, %s1867_s11, %s1868_s12  }
  0x14   :  { %s1869_s15 = smov [#allocation2]   ;;  %s1770_s19 = scalar_lea.hbm %s2005_s0, 768 }
  0x15   :  { %s21_s16 = sshll.u32 %s1869_s15, 4  ;;  %p1771_p8 = scmp.ne.s32.totalorder %s2005_s0, %s1770_s19  ;;  %s22_s16 = int_to_ptr.vmem [resolvable:$true] %s21_s16 }
  0x16   :  { %p1774_p9 = scmp.lt.u32.totalorder %s1770_s19, %s2005_s0 }
  0x18   :  { %p1776_p10 = pnand %p1774_p9, %p1771_p8 }
  0x1a   :  { %1779 = shalt.err (!%p1776_p10)
}
  0x1b   :  { %s1780_s24 = scalar_lea.vmem %s22_s16, 768  ;;  %p1785_p12 = scmp.lt.s32.totalorder %s22_s16, %s22_s16 }
  0x1c   :  { %p1781_p11 = scmp.ne.s32.totalorder %s22_s16, %s1780_s24  ;;  %p1786_p13 = scmp.lt.s32.totalorder %s1780_s24, %s1780_s24 }
  0x1e   :  { %p1787_p0 = por %p1786_p13, %p1785_p12 }
  0x20   :  { %p1788_p1 = pnand %p1787_p0, %p1781_p11 }
  0x22   :  { %1791 = shalt.err (!%p1788_p1)
}
  0x23   :  { %s1870_s1 = smov 384   ;;  %s1871_s25 = smov 24  }
  0x24   :  { %27 = dma.hbm_to_vmem [thread:$0]  %s2005_s0, 768, %s22_s16, [#allocation3], %s1870_s1, %s1870_s1, %s1871_s25  }
  0x25   :  { %s1872_s28 = smov [#allocation7]   ;;  %s1873_s30 = smov [#allocation8]  }
  0x26   :  { %s47_s29 = sshll.u32 %s1872_s28, 4  ;;  %s61_s8 = sshll.u32 %s1873_s30, 4  ;;  %s48_s29 = int_to_ptr.vmem [resolvable:$true] %s47_s29  ;;  %s1944_s8 = int_to_ptr.vmem [resolvable:$true] %s61_s8 }
  0x27   :  { %s1792_s13 = scalar_lea.hbm %s2008_s3, 4096 }
  0x28   :  { %p1793_p2 = scmp.ne.s32.totalorder %s2008_s3, %s1792_s13  ;;  %p1796_p3 = scmp.lt.u32.totalorder %s1792_s13, %s2008_s3 }
  0x2a   :  { %p1798_p4 = pnand %p1796_p3, %p1793_p2 }
  0x2c   :  { %1801 = shalt.err (!%p1798_p4)
}
  0x2d   :  { %s1802_s0 = scalar_lea.vmem %s48_s29, 4096  ;;  %p1807_p6 = scmp.lt.s32.totalorder %s48_s29, %s48_s29 }
  0x2e   :  { %p1803_p5 = scmp.ne.s32.totalorder %s48_s29, %s1802_s0  ;;  %p1808_p7 = scmp.lt.s32.totalorder %s1802_s0, %s1802_s0 }
  0x30   :  { %p1809_p8 = por %p1808_p7, %p1807_p6 }
  0x32   :  { %p1810_p9 = pnand %p1809_p8, %p1803_p5 }
  0x34   :  { %1813 = shalt.err (!%p1810_p9)
}
  0x35   :  { %53 = dma.hbm_to_vmem [thread:$0]  %s2008_s3, 4096, %s48_s29, [#allocation6], %s1867_s11, %s1867_s11, %s1868_s12  }
  0x36   :  { %s1814_s22 = scalar_lea.hbm %s2010_s5, 2048 }
  0x37   :  { %p1815_p10 = scmp.ne.s32.totalorder %s2010_s5, %s1814_s22  ;;  %p1818_p11 = scmp.lt.u32.totalorder %s1814_s22, %s2010_s5 }
  0x39   :  { %p1820_p12 = pnand %p1818_p11, %p1815_p10 }
  0x3b   :  { %1823 = shalt.err (!%p1820_p12)
}
  0x3c   :  { %s1824_s26 = scalar_lea.vmem %s1944_s8, 2048  ;;  %p1829_p0 = scmp.lt.s32.totalorder %s1944_s8, %s1944_s8 }
  0x3d   :  { %p1825_p13 = scmp.ne.s32.totalorder %s1944_s8, %s1824_s26  ;;  %p1830_p1 = scmp.lt.s32.totalorder %s1824_s26, %s1824_s26 }
  0x3f   :  { %p1831_p2 = por %p1830_p1, %p1829_p0 }
  0x41   :  { %p1832_p3 = pnand %p1831_p2, %p1825_p13 }
  0x43   :  { %1835 = shalt.err (!%p1832_p3)
}
  0x44   :  { %s1874_s3 = smov 64   ;;  %s1875_s11 = smov 4  }
  0x45   :  { %67 = dma.hbm_to_vmem [thread:$0]  %s2010_s5, 2048, %s1944_s8, [#allocation9], %s1874_s3, %s1874_s3, %s1875_s11  }
  0x46   :  { %1858 = dma.done.wait [#allocation3], 768  }
  0x47   :  { %1859 = vsyncadd [#allocation3], 4294966528 }
  0x48   :  { %1860 = dma.done.wait [#allocation6], 16384  }
  0x49   :  { %1861 = vsyncadd [#allocation6], 4294950912 }
  0x4a   :  { %1862 = dma.done.wait [#allocation9], 2048  }
  0x4b   :  { %1863 = vsyncadd [#allocation9], 4294965248  ;;  %v1523_v0 = vld [vmem:[#allocation5 + $0x104] ss:$8 sps:$4 sm:$0xff]   ;;  %v1525_v1 = vld [vmem:[#allocation5 + $0x100] ss:$8 sps:$4 sm:$0xff]  }
  0x4c   :  { %750 = vmatprep.subr.bf16.mxu0 %v1523_v0  ;;  %v1526_v2 = vld [vmem:[#allocation5 + $0x114] ss:$8 sps:$4 sm:$0xff]   ;;  %v1528_v3 = vld [vmem:[#allocation5 + $0x110] ss:$8 sps:$4 sm:$0xff]   ;;  %v1529_v4 = vld [vmem:[#allocation5 + $0x124] ss:$8 sps:$4 sm:$0xff]  }
  0x4d   :  { %751 = vmatpush1.bf16.msra.mxu0 %v1525_v1  ;;  %v1531_v5 = vld [vmem:[#allocation5 + $0x120] ss:$8 sps:$4 sm:$0xff]   ;;  %v1532_v6 = vld [vmem:[#allocation5 + $0x134] ss:$8 sps:$4 sm:$0xff]   ;;  %v1534_v7 = vld [vmem:[#allocation5 + $0x130] ss:$8 sps:$4 sm:$0xff]  }
  0x4e   :  { %752 = vmatprep.subr.bf16.mxu0 %v1526_v2  ;;  %v1535_v8 = vld [vmem:[#allocation5 + $0x144] ss:$8 sps:$4 sm:$0xff]   ;;  %v1537_v9 = vld [vmem:[#allocation5 + $0x140] ss:$8 sps:$4 sm:$0xff]   ;;  %v1538_v10 = vld [vmem:[#allocation5 + $0x154] ss:$8 sps:$4 sm:$0xff]  }
  0x4f   :  { %v1540_v11 = vld [vmem:[#allocation5 + $0x150] ss:$8 sps:$4 sm:$0xff]   ;;  %v1541_v12 = vld [vmem:[#allocation5 + $0x164] ss:$8 sps:$4 sm:$0xff]   ;;  %v1570_v14 = vld [vmem:[#allocation5] ss:$8 sps:$4 sm:$0xff]  }
  0x50   :  { %v1568_v13 = vld [vmem:[#allocation5 + $0x4] ss:$8 sps:$4 sm:$0xff]   ;;  %v1543_v15 = vld [vmem:[#allocation5 + $0x160] ss:$8 sps:$4 sm:$0xff]   ;;  %v1574_v16 = vld [vmem:[#allocation5 + $0x14] ss:$8 sps:$4 sm:$0xff]  }
  0x51   :  { %753 = vmatpush1.bf16.msra.mxu0 %v1528_v3  ;;  %707 = vmatprep.subr.bf16.mxu1 %v1568_v13  ;;  %v1576_v17 = vld [vmem:[#allocation5 + $0x10] ss:$8 sps:$4 sm:$0xff]   ;;  %v1544_v18 = vld [vmem:[#allocation5 + $0x174] ss:$8 sps:$4 sm:$0xff]   ;;  %v1583_v21 = vld [vmem:[#allocation5 + $0x24] ss:$8 sps:$4 sm:$0xff]  }
  0x52   :  { %754 = vmatprep.subr.bf16.mxu0 %v1529_v4  ;;  %708 = vmatpush1.bf16.msra.mxu1 %v1570_v14  ;;  %v1579_v19 = vld [vmem:[#allocation2 + $0xc] ss:$24 sps:$4 sm:$0xff]   ;;  %v1546_v20 = vld [vmem:[#allocation5 + $0x170] ss:$8 sps:$4 sm:$0xff]   ;;  %v1585_v22 = vld [vmem:[#allocation5 + $0x20] ss:$8 sps:$4 sm:$0xff]  }
  0x53   :  { %709 = vmatprep.subr.bf16.mxu1 %v1574_v16  ;;  %v1547_v23 = vld [vmem:[#allocation5 + $0x184] ss:$8 sps:$4 sm:$0xff]   ;;  %782 = vmatprep.mubr.bf16.mxu0 %v1579_v19  ;;  %v1549_v24 = vld [vmem:[#allocation5 + $0x180] ss:$8 sps:$4 sm:$0xff]   ;;  %v1589_v25 = vld [vmem:[#allocation5 + $0x34] ss:$8 sps:$4 sm:$0xff]  }
  0x54   :  { %v1550_v26 = vld [vmem:[#allocation5 + $0x194] ss:$8 sps:$4 sm:$0xff]   ;;  %v1591_v27 = vld [vmem:[#allocation5 + $0x30] ss:$8 sps:$4 sm:$0xff]   ;;  %v1595_v28 = vld [vmem:[#allocation5 + $0x44] ss:$8 sps:$4 sm:$0xff]  }
  0x55   :  { %755 = vmatpush1.bf16.msra.mxu0 %v1531_v5  ;;  %v1552_v29 = vld [vmem:[#allocation5 + $0x190] ss:$8 sps:$4 sm:$0xff]   ;;  %v1553_v30 = vld [vmem:[#allocation5 + $0x1a4] ss:$8 sps:$4 sm:$0xff]   ;;  %v1597_v31 = vld [vmem:[#allocation5 + $0x40] ss:$8 sps:$4 sm:$0xff]  }
  0x56   :  { %756 = vmatprep.subr.bf16.mxu0 %v1532_v6  ;;  %710 = vmatpush1.bf16.msra.mxu1 %v1576_v17  ;;  %v1601_v32 = vld [vmem:[#allocation5 + $0x54] ss:$8 sps:$4 sm:$0xff]   ;;  %v1555_v33 = vld [vmem:[#allocation5 + $0x1a0] ss:$8 sps:$4 sm:$0xff]   ;;  %v1603_v35 = vld [vmem:[#allocation5 + $0x50] ss:$8 sps:$4 sm:$0xff]  }
  0x57   :  { %711 = vmatprep.subr.bf16.mxu1 %v1583_v21  ;;  %v1556_v34 = vld [vmem:[#allocation5 + $0x1b4] ss:$8 sps:$4 sm:$0xff]   ;;  %v1607_v36 = vld [vmem:[#allocation5 + $0x64] ss:$8 sps:$4 sm:$0xff]   ;;  %v1558_v37 = vld [vmem:[#allocation5 + $0x1b0] ss:$8 sps:$4 sm:$0xff]  }
  0x58   :  { %v1559_v38 = vld [vmem:[#allocation5 + $0x1c4] ss:$8 sps:$4 sm:$0xff]   ;;  %v1609_v39 = vld [vmem:[#allocation5 + $0x60] ss:$8 sps:$4 sm:$0xff]   ;;  %v1613_v40 = vld [vmem:[#allocation5 + $0x74] ss:$8 sps:$4 sm:$0xff]  }
  0x59   :  { %757 = vmatpush1.bf16.msra.mxu0 %v1534_v7  ;;  %v1561_v41 = vld [vmem:[#allocation5 + $0x1c0] ss:$8 sps:$4 sm:$0xff]   ;;  %v1562_v42 = vld [vmem:[#allocation5 + $0x1d4] ss:$8 sps:$4 sm:$0xff]   ;;  %v1615_v43 = vld [vmem:[#allocation5 + $0x70] ss:$8 sps:$4 sm:$0xff]  }
  0x5a   :  { %758 = vmatprep.subr.bf16.mxu0 %v1535_v8  ;;  %712 = vmatpush1.bf16.msra.mxu1 %v1585_v22  ;;  %v1619_v44 = vld [vmem:[#allocation5 + $0x84] ss:$8 sps:$4 sm:$0xff]   ;;  %v1564_v45 = vld [vmem:[#allocation5 + $0x1d0] ss:$8 sps:$4 sm:$0xff]   ;;  %v1621_v47 = vld [vmem:[#allocation5 + $0x80] ss:$8 sps:$4 sm:$0xff]  }
  0x5b   :  { %713 = vmatprep.subr.bf16.mxu1 %v1589_v25  ;;  %v1565_v46 = vld [vmem:[#allocation5 + $0x1e4] ss:$8 sps:$4 sm:$0xff]   ;;  %v1625_v48 = vld [vmem:[#allocation5 + $0x94] ss:$8 sps:$4 sm:$0xff]   ;;  %v1567_v49 = vld [vmem:[#allocation5 + $0x1e0] ss:$8 sps:$4 sm:$0xff]  }
  0x5c   :  { %v1571_v50 = vld [vmem:[#allocation5 + $0x1f4] ss:$8 sps:$4 sm:$0xff]   ;;  %v1627_v51 = vld [vmem:[#allocation5 + $0x90] ss:$8 sps:$4 sm:$0xff]   ;;  %v1631_v52 = vld [vmem:[#allocation5 + $0xa4] ss:$8 sps:$4 sm:$0xff]  }
  0x5d   :  { %759 = vmatpush1.bf16.msra.mxu0 %v1537_v9  ;;  %v1573_v53 = vld [vmem:[#allocation5 + $0x1f0] ss:$8 sps:$4 sm:$0xff]   ;;  %v1582_v54 = vld [vmem:[#allocation5 + $0x204] ss:$8 sps:$4 sm:$0xff]   ;;  %v1633_v55 = vld [vmem:[#allocation5 + $0xa0] ss:$8 sps:$4 sm:$0xff]  }
  0x5e   :  { %760 = vmatprep.subr.bf16.mxu0 %v1538_v10  ;;  %714 = vmatpush1.bf16.msra.mxu1 %v1591_v27  ;;  %v1637_v56 = vld [vmem:[#allocation5 + $0xb4] ss:$8 sps:$4 sm:$0xff]   ;;  %v1577_v57 = vld [vmem:[#allocation2 + $0x8] ss:$24 sps:$4 sm:$0xff]   ;;  %v1580_v58 = vld [vmem:[#allocation5 + $0x200] ss:$8 sps:$4 sm:$0xff]  }
  0x5f   :  { %715 = vmatprep.subr.bf16.mxu1 %v1595_v28  ;;  %v1588_v59 = vld [vmem:[#allocation5 + $0x214] ss:$8 sps:$4 sm:$0xff]   ;;  %v1639_v60 = vld [vmem:[#allocation5 + $0xb0] ss:$8 sps:$4 sm:$0xff]   ;;  %v1643_v61 = vld [vmem:[#allocation5 + $0xc4] ss:$8 sps:$4 sm:$0xff]  }
  0x60   :  { %v1669_v62 = vld [vmem:[#allocation2 + $0x4] ss:$24 sps:$4 sm:$0xff]   ;;  %v1586_v63 = vld [vmem:[#allocation5 + $0x210] ss:$8 sps:$4 sm:$0xff]   ;;  %v1645_v1 = vld [vmem:[#allocation5 + $0xc0] ss:$8 sps:$4 sm:$0xff]  }
  0x61   :  { %761 = vmatpush1.bf16.msra.mxu0 %v1540_v11  ;;  %v1594_v0 = vld [vmem:[#allocation5 + $0x224] ss:$8 sps:$4 sm:$0xff]   ;;  %v1649_v3 = vld [vmem:[#allocation5 + $0xd4] ss:$8 sps:$4 sm:$0xff]   ;;  %739 = vmatprep.mubr.bf16.mxu1 %v1669_v62  ;;  %v1592_v4 = vld [vmem:[#allocation5 + $0x220] ss:$8 sps:$4 sm:$0xff]  }
  0x62   :  { %762 = vmatprep.subr.bf16.mxu0 %v1541_v12  ;;  %716 = vmatpush1.bf16.msra.mxu1 %v1597_v31  ;;  %v1675_v2 = vld [vmem:[#allocation2 + $0x14] ss:$24 sps:$4 sm:$0xff]   ;;  %v1651_v6 = vld [vmem:[#allocation5 + $0xd0] ss:$8 sps:$4 sm:$0xff]   ;;  %v1657_v10 = vld [vmem:[#allocation5 + $0xe0] ss:$8 sps:$4 sm:$0xff]  }
  0x63   :  { %717 = vmatprep.subr.bf16.mxu1 %v1601_v32  ;;  %v1600_v5 = vld [vmem:[#allocation5 + $0x234] ss:$8 sps:$4 sm:$0xff]   ;;  %v1655_v7 = vld [vmem:[#allocation5 + $0xe4] ss:$8 sps:$4 sm:$0xff]   ;;  %v1598_v8 = vld [vmem:[#allocation5 + $0x230] ss:$8 sps:$4 sm:$0xff]  }
  0x64   :  { %v1606_v9 = vld [vmem:[#allocation5 + $0x244] ss:$8 sps:$4 sm:$0xff]   ;;  %v1661_v11 = vld [vmem:[#allocation5 + $0xf4] ss:$8 sps:$4 sm:$0xff]   ;;  %v1604_v12 = vld [vmem:[#allocation5 + $0x240] ss:$8 sps:$4 sm:$0xff]  }
  0x65   :  { %763 = vmatpush1.bf16.msra.mxu0 %v1543_v15  ;;  %v1612_v13 = vld [vmem:[#allocation5 + $0x254] ss:$8 sps:$4 sm:$0xff]   ;;  %v1663_v14 = vld [vmem:[#allocation5 + $0xf0] ss:$8 sps:$4 sm:$0xff]   ;;  %v1678_v15 = vld [vmem:[#allocation7 + $0x4] ss:$8 sps:$4 sm:$0xff]  }
  0x66   :  { %764 = vmatprep.subr.bf16.mxu0 %v1544_v18  ;;  %718 = vmatpush1.bf16.msra.mxu1 %v1603_v35  ;;  %v1610_v16 = vld [vmem:[#allocation5 + $0x250] ss:$8 sps:$4 sm:$0xff]   ;;  %v1618_v18 = vld [vmem:[#allocation5 + $0x264] ss:$8 sps:$4 sm:$0xff]   ;;  %v1676_v19 = vld [vmem:[#allocation7] ss:$8 sps:$4 sm:$0xff]  }
  0x67   :  { %719 = vmatprep.subr.bf16.mxu1 %v1607_v36  ;;  %v1667_v17 = vld [vmem:[#allocation2] ss:$24 sps:$4 sm:$0xff]   ;;  %v1630_v27 = vld [vmem:[#allocation5 + $0x284] ss:$8 sps:$4 sm:$0xff]   ;;  %v1687_v28 = vld [vmem:[#allocation7 + $0x34] ss:$8 sps:$4 sm:$0xff]  }
  0x68   :  { %v1616_v21 = vld [vmem:[#allocation5 + $0x260] ss:$8 sps:$4 sm:$0xff]   ;;  %v1679_v22 = vld [vmem:[#allocation7 + $0x10] ss:$8 sps:$4 sm:$0xff]   ;;  %v1636_v31 = vld [vmem:[#allocation5 + $0x294] ss:$8 sps:$4 sm:$0xff]  }
  0x69   :  { %765 = vmatpush1.bf16.msra.mxu0 %v1546_v20  ;;  %v1681_v20 = vld [vmem:[#allocation7 + $0x14] ss:$8 sps:$4 sm:$0xff]   ;;  %v1622_v25 = vld [vmem:[#allocation5 + $0x270] ss:$8 sps:$4 sm:$0xff]   ;;  %v1690_v32 = vld [vmem:[#allocation7 + $0x44] ss:$8 sps:$4 sm:$0xff]  }
  0x6a   :  { %766 = vmatprep.subr.bf16.mxu0 %v1547_v23  ;;  %720 = vmatpush1.bf16.msra.mxu1 %v1609_v39  ;;  %v1624_v23 = vld [vmem:[#allocation5 + $0x274] ss:$8 sps:$4 sm:$0xff]   ;;  %v1642_v35 = vld [vmem:[#allocation5 + $0x2a4] ss:$8 sps:$4 sm:$0xff]   ;;  %v1712_v62 = vld [vmem:[#allocation7 + $0xc0] ss:$8 sps:$4 sm:$0xff]  }
  0x6b   :  { %721 = vmatprep.subr.bf16.mxu1 %v1613_v40  ;;  %v1693_v36 = vld [vmem:[#allocation7 + $0x54] ss:$8 sps:$4 sm:$0xff]   ;;  %v1696_v40 = vld [vmem:[#allocation7 + $0x64] ss:$8 sps:$4 sm:$0xff]  }
  0x6c   :  { %v1648_v39 = vld [vmem:[#allocation5 + $0x2b4] ss:$8 sps:$4 sm:$0xff]  }
  0x6d   :  { %767 = vmatpush1.bf16.msra.mxu0 %v1549_v24  ;;  %v1684_v24 = vld [vmem:[#allocation7 + $0x24] ss:$8 sps:$4 sm:$0xff]  }
  0x6e   :  { %768 = vmatprep.subr.bf16.mxu0 %v1550_v26  ;;  %722 = vmatpush1.bf16.msra.mxu1 %v1615_v43  ;;  %v1682_v26 = vld [vmem:[#allocation7 + $0x20] ss:$8 sps:$4 sm:$0xff]   ;;  %v1654_v43 = vld [vmem:[#allocation5 + $0x2c4] ss:$8 sps:$4 sm:$0xff]  }
  0x6f   :  { %723 = vmatprep.subr.bf16.mxu1 %v1619_v44  ;;  %v1699_v44 = vld [vmem:[#allocation7 + $0x74] ss:$8 sps:$4 sm:$0xff]  }
  0x71   :  { %769 = vmatpush1.bf16.msra.mxu0 %v1552_v29  ;;  %v1628_v29 = vld [vmem:[#allocation5 + $0x280] ss:$8 sps:$4 sm:$0xff]  }
  0x72   :  { %770 = vmatprep.subr.bf16.mxu0 %v1553_v30  ;;  %724 = vmatpush1.bf16.msra.mxu1 %v1621_v47  ;;  %v1685_v30 = vld [vmem:[#allocation7 + $0x30] ss:$8 sps:$4 sm:$0xff]   ;;  %v1660_v47 = vld [vmem:[#allocation5 + $0x2d4] ss:$8 sps:$4 sm:$0xff]  }
  0x73   :  { %725 = vmatprep.subr.bf16.mxu1 %v1625_v48  ;;  %v1702_v48 = vld [vmem:[#allocation7 + $0x84] ss:$8 sps:$4 sm:$0xff]  }
  0x75   :  { %771 = vmatpush1.bf16.msra.mxu0 %v1555_v33  ;;  %v1634_v33 = vld [vmem:[#allocation5 + $0x290] ss:$8 sps:$4 sm:$0xff]  }
  0x76   :  { %772 = vmatprep.subr.bf16.mxu0 %v1556_v34  ;;  %726 = vmatpush1.bf16.msra.mxu1 %v1627_v51  ;;  %v1688_v34 = vld [vmem:[#allocation7 + $0x40] ss:$8 sps:$4 sm:$0xff]   ;;  %v1666_v51 = vld [vmem:[#allocation5 + $0x2e4] ss:$8 sps:$4 sm:$0xff]  }
  0x77   :  { %727 = vmatprep.subr.bf16.mxu1 %v1631_v52  ;;  %v1705_v52 = vld [vmem:[#allocation7 + $0x94] ss:$8 sps:$4 sm:$0xff]  }
  0x79   :  { %773 = vmatpush1.bf16.msra.mxu0 %v1558_v37  ;;  %v1640_v37 = vld [vmem:[#allocation5 + $0x2a0] ss:$8 sps:$4 sm:$0xff]  }
  0x7a   :  { %774 = vmatprep.subr.bf16.mxu0 %v1559_v38  ;;  %728 = vmatpush1.bf16.msra.mxu1 %v1633_v55  ;;  %v1691_v38 = vld [vmem:[#allocation7 + $0x50] ss:$8 sps:$4 sm:$0xff]   ;;  %v1672_v55 = vld [vmem:[#allocation5 + $0x2f4] ss:$8 sps:$4 sm:$0xff]  }
  0x7b   :  { %729 = vmatprep.subr.bf16.mxu1 %v1637_v56  ;;  %v1708_v56 = vld [vmem:[#allocation7 + $0xa4] ss:$8 sps:$4 sm:$0xff]  }
  0x7d   :  { %775 = vmatpush1.bf16.msra.mxu0 %v1561_v41  ;;  %v1646_v41 = vld [vmem:[#allocation5 + $0x2b0] ss:$8 sps:$4 sm:$0xff]  }
  0x7e   :  { %776 = vmatprep.subr.bf16.mxu0 %v1562_v42  ;;  %730 = vmatpush1.bf16.msra.mxu1 %v1639_v60  ;;  %v1694_v42 = vld [vmem:[#allocation7 + $0x60] ss:$8 sps:$4 sm:$0xff]  }
  0x7f   :  { %731 = vmatprep.subr.bf16.mxu1 %v1643_v61  ;;  %v1673_v60 = vld [vmem:[#allocation2 + $0x10] ss:$24 sps:$4 sm:$0xff]  }
  0x80   :  { %v1709_v61 = vld [vmem:[#allocation7 + $0xb0] ss:$8 sps:$4 sm:$0xff]  }
  0x81   :  { %777 = vmatpush1.bf16.msra.mxu0 %v1564_v45  ;;  %v1652_v45 = vld [vmem:[#allocation5 + $0x2c0] ss:$8 sps:$4 sm:$0xff]  }
  0x82   :  { %778 = vmatprep.subr.bf16.mxu0 %v1565_v46  ;;  %732 = vmatpush1.bf16.msra.mxu1 %v1645_v1  ;;  %v1697_v46 = vld [vmem:[#allocation7 + $0x70] ss:$8 sps:$4 sm:$0xff]   ;;  %v1717_v1 = vld [vmem:[#allocation7 + $0xd4] ss:$8 sps:$4 sm:$0xff]  }
  0x83   :  { %733 = vmatprep.subr.bf16.mxu1 %v1649_v3  ;;  %v1718_v3 = vld [vmem:[#allocation7 + $0xe0] ss:$8 sps:$4 sm:$0xff]  }
  0x85   :  { %779 = vmatpush1.bf16.msra.mxu0 %v1567_v49  ;;  %v1658_v49 = vld [vmem:[#allocation5 + $0x2d0] ss:$8 sps:$4 sm:$0xff]  }
  0x86   :  { %780 = vmatprep.subr.bf16.mxu0 %v1571_v50  ;;  %734 = vmatpush1.bf16.msra.mxu1 %v1651_v6  ;;  %v1700_v50 = vld [vmem:[#allocation7 + $0x80] ss:$8 sps:$4 sm:$0xff]  }
  0x87   :  { %735 = vmatprep.subr.bf16.mxu1 %v1655_v7  ;;  %v1724_v6 = vld [vmem:[#allocation8 + $0x40] sm:$0xff]  }
  0x89   :  { %781 = vmatpush1.bf16.msra.mxu0 %v1573_v53  ;;  %v1664_v53 = vld [vmem:[#allocation5 + $0x2e0] ss:$8 sps:$4 sm:$0xff]  }
  0x8a   :  { %793 = vmatprep.subr.bf16.mxu0 %v1582_v54  ;;  %736 = vmatpush1.bf16.msra.mxu1 %v1657_v10  ;;  %v1703_v54 = vld [vmem:[#allocation7 + $0x90] ss:$8 sps:$4 sm:$0xff]  }
  0x8b   :  { %737 = vmatprep.subr.bf16.mxu1 %v1661_v11  ;;  %v187_v11 = vlaneseq }
  0x8c   :  { %783 = vmatmul.mubr.bf16.vlgmr.msra.gmra.mrb[0].mxu0 %v1577_v57  ;;  %v1670_v57 = vld [vmem:[#allocation5 + $0x2f0] ss:$8 sps:$4 sm:$0xff]  }
  0x8d   :  { %794 = vmatpush1.bf16.msra.mxu0 %v1580_v58  ;;  %825 = vmatprep.mubr.bf16.mxu0 %v1675_v2  ;;  %v1706_v58 = vld [vmem:[#allocation7 + $0xa0] ss:$8 sps:$4 sm:$0xff]   ;;  %v1720_v2 = vld [vmem:[#allocation7 + $0xe4] ss:$8 sps:$4 sm:$0xff]  }
  0x8e   :  { %795 = vmatprep.subr.bf16.mxu0 %v1588_v59  ;;  %738 = vmatpush1.bf16.msra.mxu1 %v1663_v14  ;;  %v1711_v59 = vld [vmem:[#allocation7 + $0xb4] ss:$8 sps:$4 sm:$0xff]   ;;  %v185_v14 = vld [vmem:[%s2007_s2] sm:$0x3] }
  0x8f   :  { %1046 = vmatprep.subr.bf16.mxu1 %v1678_v15 }
  0x91   :  { %796 = vmatpush1.bf16.msra.mxu0 %v1586_v63  ;;  %740 = vmatmul.mubr.bf16.vlgmr.msra.gmra.mrb[0].mxu1 %v1667_v17  ;;  %v1714_v63 = vld [vmem:[#allocation7 + $0xc4] ss:$8 sps:$4 sm:$0xff]  }
  0x92   :  { %797 = vmatprep.subr.bf16.mxu0 %v1594_v0  ;;  %1047 = vmatpush1.bf16.msra.mxu1 %v1676_v19  ;;  %v1715_v0 = vld [vmem:[#allocation7 + $0xd0] ss:$8 sps:$4 sm:$0xff]  }
  0x93   :  { %1048 = vmatprep.subr.bf16.mxu1 %v1681_v20 }
  0x95   :  { %798 = vmatpush1.bf16.msra.mxu0 %v1592_v4  ;;  %v1723_v4 = vld [vmem:[#allocation7 + $0xf4] ss:$8 sps:$4 sm:$0xff]  }
  0x96   :  { %799 = vmatprep.subr.bf16.mxu0 %v1600_v5  ;;  %1049 = vmatpush1.bf16.msra.mxu1 %v1679_v22  ;;  %v1721_v5 = vld [vmem:[#allocation7 + $0xf0] ss:$8 sps:$4 sm:$0xff]  }
  0x97   :  { %1050 = vmatprep.subr.bf16.mxu1 %v1684_v24 }
  0x99   :  { %800 = vmatpush1.bf16.msra.mxu0 %v1598_v8 }
  0x9a   :  { %801 = vmatprep.subr.bf16.mxu0 %v1606_v9  ;;  %1051 = vmatpush1.bf16.msra.mxu1 %v1682_v26 }
  0x9b   :  { %1052 = vmatprep.subr.bf16.mxu1 %v1687_v28 }
  0x9d   :  { %802 = vmatpush1.bf16.msra.mxu0 %v1604_v12  ;;  %v188_v12 = vshrl.u32 %v187_v11, 7 }
  0x9e   :  { %803 = vmatprep.subr.bf16.mxu0 %v1612_v13  ;;  %1053 = vmatpush1.bf16.msra.mxu1 %v1685_v30 }
  0x9f   :  { %1054 = vmatprep.subr.bf16.mxu1 %v1690_v32  ;;  %v189_v13 = vsub.s32 0, %v188_v12  ;;  %v193_v15 = vsub.s32 1, %v188_v12 }
  0xa1   :  { %804 = vmatpush1.bf16.msra.mxu0 %v1610_v16  ;;  %v190_v16 = vrot.slane %v185_v14, %v189_v13  ;;  %v194_v17 = vrot.slane %v185_v14, %v193_v15 }
  0xa2   :  { %805 = vmatprep.subr.bf16.mxu0 %v1618_v18  ;;  %1055 = vmatpush1.bf16.msra.mxu1 %v1688_v34 }
  0xa3   :  { %1056 = vmatprep.subr.bf16.mxu1 %v1693_v36  ;;  %v1725_v36 = vld [vmem:[#allocation8] sm:$0xff]  }
  0xa5   :  { %806 = vmatpush1.bf16.msra.mxu0 %v1616_v21 }
  0xa6   :  { %807 = vmatprep.subr.bf16.mxu0 %v1624_v23  ;;  %1057 = vmatpush1.bf16.msra.mxu1 %v1691_v38  ;;  %v1727_v38 = vld [vmem:[#allocation8 + $0x8] sm:$0xff]  }
  0xa7   :  { %1058 = vmatprep.subr.bf16.mxu1 %v1696_v40  ;;  %v1729_v40 = vld [vmem:[#allocation8 + $0x10] sm:$0xff]  }
  0xa9   :  { %808 = vmatpush1.bf16.msra.mxu0 %v1622_v25 }
  0xaa   :  { %809 = vmatprep.subr.bf16.mxu0 %v1630_v27  ;;  %1059 = vmatpush1.bf16.msra.mxu1 %v1694_v42  ;;  %v1731_v42 = vld [vmem:[#allocation8 + $0x18] sm:$0xff]  }
  0xab   :  { %1060 = vmatprep.subr.bf16.mxu1 %v1699_v44  ;;  %v1733_v44 = vld [vmem:[#allocation8 + $0x20] sm:$0xff]  }
  0xad   :  { %810 = vmatpush1.bf16.msra.mxu0 %v1628_v29 }
  0xae   :  { %811 = vmatprep.subr.bf16.mxu0 %v1636_v31  ;;  %1061 = vmatpush1.bf16.msra.mxu1 %v1697_v46  ;;  %v1735_v46 = vld [vmem:[#allocation8 + $0x28] sm:$0xff]  }
  0xaf   :  { %1062 = vmatprep.subr.bf16.mxu1 %v1702_v48  ;;  %v1737_v48 = vld [vmem:[#allocation8 + $0x30] sm:$0xff]  }
  0xb1   :  { %812 = vmatpush1.bf16.msra.mxu0 %v1634_v33 }
  0xb2   :  { %813 = vmatprep.subr.bf16.mxu0 %v1642_v35  ;;  %1063 = vmatpush1.bf16.msra.mxu1 %v1700_v50  ;;  %v1739_v50 = vld [vmem:[#allocation8 + $0x38] sm:$0xff]  }
  0xb3   :  { %1064 = vmatprep.subr.bf16.mxu1 %v1705_v52 }
  0xb5   :  { %814 = vmatpush1.bf16.msra.mxu0 %v1640_v37  ;;  %v1726_v37 = vld [vmem:[#allocation8 + $0x48] sm:$0xff]  }
  0xb6   :  { %815 = vmatprep.subr.bf16.mxu0 %v1648_v39  ;;  %1065 = vmatpush1.bf16.msra.mxu1 %v1703_v54  ;;  %v1728_v39 = vld [vmem:[#allocation8 + $0x50] sm:$0xff]  }
  0xb7   :  { %1066 = vmatprep.subr.bf16.mxu1 %v1708_v56 }
  0xb9   :  { %816 = vmatpush1.bf16.msra.mxu0 %v1646_v41  ;;  %v1730_v41 = vld [vmem:[#allocation8 + $0x58] sm:$0xff]  }
  0xba   :  { %817 = vmatprep.subr.bf16.mxu0 %v1654_v43  ;;  %1067 = vmatpush1.bf16.msra.mxu1 %v1706_v58  ;;  %v1732_v43 = vld [vmem:[#allocation8 + $0x60] sm:$0xff]  }
  0xbb   :  { %1068 = vmatprep.subr.bf16.mxu1 %v1711_v59 }
  0xbd   :  { %818 = vmatpush1.bf16.msra.mxu0 %v1652_v45  ;;  %v1734_v45 = vld [vmem:[#allocation8 + $0x68] sm:$0xff]  }
  0xbe   :  { %819 = vmatprep.subr.bf16.mxu0 %v1660_v47  ;;  %1069 = vmatpush1.bf16.msra.mxu1 %v1709_v61  ;;  %v1736_v47 = vld [vmem:[#allocation8 + $0x70] sm:$0xff]  }
  0xbf   :  { %1070 = vmatprep.subr.bf16.mxu1 %v1714_v63 }
  0xc1   :  { %820 = vmatpush1.bf16.msra.mxu0 %v1658_v49  ;;  %v1738_v49 = vld [vmem:[#allocation8 + $0x78] sm:$0xff]  }
  0xc2   :  { %821 = vmatprep.subr.bf16.mxu0 %v1666_v51  ;;  %1071 = vmatpush1.bf16.msra.mxu1 %v1712_v62  ;;  %v874_v51 = vld [vmem:[%s2009_s4] sm:$0x3] }
  0xc3   :  { %1072 = vmatprep.subr.bf16.mxu1 %v1717_v1  ;;  %v879_v52 = vrot.slane %v874_v51, %v189_v13 }
  0xc5   :  { %822 = vmatpush1.bf16.msra.mxu0 %v1664_v53  ;;  %v883_v53 = vrot.slane %v874_v51, %v193_v15 }
  0xc6   :  { %823 = vmatprep.subr.bf16.mxu0 %v1672_v55  ;;  %1073 = vmatpush1.bf16.msra.mxu1 %v1715_v0 }
  0xc7   :  { %1074 = vmatprep.subr.bf16.mxu1 %v1720_v2 }
  0xc9   :  { %824 = vmatpush1.bf16.msra.mxu0 %v1670_v57 }
  0xca   :  { %1075 = vmatpush1.bf16.msra.mxu1 %v1718_v3 }
  0xcb   :  { %1076 = vmatprep.subr.bf16.mxu1 %v1723_v4 }
  0xcc   :  { %826 = vmatmul.mubr.bf16.vlgmr.msra.gmra.mrb[0].mxu0 %v1673_v60 }
  0xce   :  { %1077 = vmatpush1.bf16.msra.mxu1 %v1721_v5 }
  0xcf   :  { %1478 = vmatprep.subr.bf16.mxu1 %v1724_v6  ;;  %v1452_v6 = vld [vmem:[%s2011_s6] ss:$0 sm:$0xff]  ;;  %s1876_s6 = smov [#allocation10]  }
  0xd0   :  { %s1304_s8 = sshll.u32 %s1876_s6, 4  ;;  %s1305_s8 = int_to_ptr.vmem [resolvable:$true] %s1304_s8 }
  0xd1   :  { %s1836_s9 = scalar_lea.vmem %s1305_s8, 128  ;;  %p1841_p5 = scmp.lt.s32.totalorder %s1305_s8, %s1305_s8 }
  0xd2   :  { %p1837_p4 = scmp.ne.s32.totalorder %s1305_s8, %s1836_s9  ;;  %p1842_p6 = scmp.lt.s32.totalorder %s1836_s9, %s1836_s9 }
  0xd4   :  { %p1843_p7 = por %p1842_p6, %p1841_p5 }
  0xd6   :  { %p1844_p8 = pnand %p1843_p7, %p1837_p4 }
 0x164   :  { %v741_v7 = vpop.f32.mrb[0].mxu1 }
 0x165   :  { %v743_v8 = vpop.f32.mrb[1].mxu1  ;;  %v742_v18 = vadd.f32 %v741_v7, %v190_v16 }
 0x166   :  { %v745_v9 = vpop.f32.mrb[2].mxu1  ;;  %v744_v19 = vadd.f32 %v743_v8, %v194_v17 }
 0x167   :  { %v747_v10 = vpop.f32.mrb[3].mxu1  ;;  %v746_v21 = vadd.f32 %v745_v9, %v190_v16 }
 0x168   :  { %v748_v24 = vadd.f32 %v747_v10, %v194_v17 }
 0x19f   :  { %v827_v20 = vpop.f32.mrb[0].mxu0 }
 0x1a0   :  { %v1501_v22 = vadd.f32 %v827_v20, %v742_v18  ;;  %v829_v23 = vpop.f32.mrb[1].mxu0 }
 0x1a1   :  { %v1503_v25 = vadd.f32 %v829_v23, %v744_v19  ;;  %v831_v26 = vpop.f32.mrb[2].mxu0 }
 0x1a2   :  { %v1505_v27 = vadd.f32 %v831_v26, %v746_v21  ;;  %v833_v28 = vpop.f32.mrb[3].mxu0  ;;  %v836_v30 = vmax.f32 %v1501_v22, 0.0 }
 0x1a3   :  { %v1507_v29 = vadd.f32 %v833_v28, %v748_v24  ;;  %v837_v32 = vmax.f32 %v1503_v25, 0.0 }
 0x1a4   :  { %v838_v31 = vmax.f32 %v1505_v27, 0.0 }
 0x1a5   :  { %v839_v33 = vmax.f32 %v1507_v29, 0.0 }
 0x1a6   :  { %v840_v34 = vpack.c.bf16 %v838_v31, %v836_v30 }
 0x1a7   :  { %v841_v35 = vpack.c.bf16 %v839_v33, %v837_v32 }
 0x1a9   :  { %1078 = vmatprep.mubr.bf16.mxu1 %v841_v35 }
 0x1aa   :  { %1079 = vmatmul.mubr.bf16.vlgmr.msra.gmra.mrb[4].mxu1 %v840_v34 }
 0x1ab   :  { %1479 = vmatpush3.bf16.msra.mxu1 %v1725_v36 }
 0x1ac   :  { %1480 = vmatprep.subr.bf16.mxu1 %v1726_v37 }
 0x1af   :  { %1481 = vmatpush3.bf16.msra.mxu1 %v1727_v38 }
 0x1b0   :  { %1482 = vmatprep.subr.bf16.mxu1 %v1728_v39 }
 0x1b3   :  { %1483 = vmatpush3.bf16.msra.mxu1 %v1729_v40 }
 0x1b4   :  { %1484 = vmatprep.subr.bf16.mxu1 %v1730_v41 }
 0x1b7   :  { %1485 = vmatpush3.bf16.msra.mxu1 %v1731_v42 }
 0x1b8   :  { %1486 = vmatprep.subr.bf16.mxu1 %v1732_v43 }
 0x1bb   :  { %1487 = vmatpush3.bf16.msra.mxu1 %v1733_v44 }
 0x1bc   :  { %1488 = vmatprep.subr.bf16.mxu1 %v1734_v45 }
 0x1bf   :  { %1489 = vmatpush3.bf16.msra.mxu1 %v1735_v46 }
 0x1c0   :  { %1490 = vmatprep.subr.bf16.mxu1 %v1736_v47 }
 0x1c3   :  { %1491 = vmatpush3.bf16.msra.mxu1 %v1737_v48 }
 0x1c4   :  { %1492 = vmatprep.subr.bf16.mxu1 %v1738_v49 }
 0x1c7   :  { %1493 = vmatpush3.bf16.msra.mxu1 %v1739_v50 }
 0x27d   :  { %v1080_v54 = vpop.f32.mrb[4].mxu1 }
 0x27e   :  { %v1081_v55 = vadd.f32 %v1080_v54, %v879_v52  ;;  %v1082_v56 = vpop.f32.mrb[5].mxu1 }
 0x27f   :  { %v1083_v57 = vadd.f32 %v1082_v56, %v883_v53  ;;  %v1084_v58 = vpop.f32.mrb[6].mxu1 }
 0x280   :  { %v1085_v59 = vadd.f32 %v1084_v58, %v879_v52  ;;  %v1086_v60 = vpop.f32.mrb[7].mxu1  ;;  %v1089_v62 = vmax.f32 %v1081_v55, 0.0 }
 0x281   :  { %v1087_v61 = vadd.f32 %v1086_v60, %v883_v53  ;;  %v1090_v0 = vmax.f32 %v1083_v57, 0.0 }
 0x282   :  { %v1091_v63 = vmax.f32 %v1085_v59, 0.0 }
 0x283   :  { %v1092_v1 = vmax.f32 %v1087_v61, 0.0 }
 0x284   :  { %v1093_v2 = vpack.c.bf16 %v1091_v63, %v1089_v62 }
 0x285   :  { %v1094_v3 = vpack.c.bf16 %v1092_v1, %v1090_v0 }
 0x287   :  { %1262 = vmatprep.mubr.bf16.mxu1 %v1094_v3 }
 0x288   :  { %1263 = vmatmul.mubr.bf16.vlgmr.msra.gmra.mrb[8].mxu1 %v1093_v2 }
 0x35b   :  { %v1494_v4 = vpop.f32.mrb[8].mxu1 }
 0x35c   :  { %v1495_v5 = vpop.f32.mrb[9].mxu1 }
 0x35d   :  { %v1496_v7 = vadd.f32 %v1495_v5, %v1494_v4  ;;  %v1497_v8 = vpop.f32.mrb[10].mxu1 }
 0x35e   :  { %v1498_v9 = vpop.f32.mrb[11].mxu1 }
 0x35f   :  { %v1499_v10 = vadd.f32 %v1498_v9, %v1497_v8  ;;  %v1265_v11 = vadd.f32 %v1496_v7, %v1452_v6 }
 0x361   :  { %1271 = vmax.xlane.f32.xlu0 %v1265_v11  ;;  %v1268_v12 = vadd.f32 %v1499_v10, %v1452_v6 }
 0x365   :  { %1273 = vmax.xlane.f32.xlu0 %v1268_v12 }
 0x3ee   :  { %v1272_v13 = vpop.xlane.xlu0 %1271 }
 0x3ef   :  { %v1275_v14 = vsub.f32 %v1265_v11, %v1272_v13 }
 0x3f1   :  { %v1277_v15 = vmul.f32 1.442695, %v1275_v14 }
 0x3f2   :  { %v1274_v16 = vpop.xlane.xlu0 %1273 }
 0x3f3   :  { %1740 = vpow2.f32 %v1277_v15  ;;  %v1276_v17 = vsub.f32 %v1268_v12, %v1274_v16 }
 0x3f5   :  { %v1279_v18 = vmul.f32 1.442695, %v1276_v17 }
 0x3f7   :  { %1742 = vpow2.f32 %v1279_v18 }
 0x3fd   :  { %v1741_v19 = vpop.eup %1740 }
 0x3fe   :  { %1281 = vadd.xlane.f32.xlu1 %v1741_v19 }
 0x401   :  { %v1743_v20 = vpop.eup %1742 }
 0x402   :  { %1283 = vadd.xlane.f32.xlu1 %v1743_v20 }
 0x48b   :  { %v1282_v21 = vpop.xlane.xlu1 %1281 }
 0x48c   :  { %1744 = vrcp.f32 %v1282_v21 }
 0x48f   :  { %v1284_v22 = vpop.xlane.xlu1 %1283 }
 0x490   :  { %1746 = vrcp.f32 %v1284_v22 }
 0x496   :  { %v1745_v23 = vpop.eup %1744 }
 0x497   :  { %v1286_v25 = vmul.f32 %v1745_v23, %v1741_v19 }
 0x49a   :  { %v1747_v24 = vpop.eup %1746 }
 0x49b   :  { %v1288_v26 = vmul.f32 %v1747_v24, %v1743_v20 }
 0x49d   :  { %v1476_v27 = vpack.c.bf16 %v1288_v26, %v1286_v25 }
 0x49f   :  { %1477 = vst [vmem:[#allocation10] sm:$0xff] %v1476_v27  }
 0x4a0   :  { %1847 = shalt.err (!%p1844_p8)
}
 0x4a1   :  { %s1848_s14 = scalar_lea.hbm %s2012_s7, 128 }
 0x4a2   :  { %p1849_p9 = scmp.ne.s32.totalorder %s2012_s7, %s1848_s14  ;;  %p1852_p10 = scmp.lt.u32.totalorder %s1848_s14, %s2012_s7 }
 0x4a4   :  { %p1854_p11 = pnand %p1852_p10, %p1849_p9 }
 0x4a6   :  { %1857 = shalt.err (!%p1854_p11)
}
 0x4a7   :  { %1310 = dma.vmem_to_hbm [thread:$0]  %s1305_s8, 128, %s2012_s7, [#allocation4], %s1874_s3, %s1874_s3, %s1875_s11  }
 0x4a8   :  { %1864 = dma.done.wait [#allocation4], 128  }
 0x4a9   :  { %1865 = vsyncadd [#allocation4], 4294967168 }
 0x4aa   :  { %1314 = vsyncpa [#allocation3], 1 }
 0x4ab   :  { %1315 = vsyncpa [#allocation6], 1 }
 0x4ac   :  { %1316 = vsyncpa [#allocation9], 1 }
 0x4ad   :  { %1317 = vsyncpa [#allocation4], 1 }

</bundles_post_ra>
